<compile_context>
chip_gen: v5e
topology: v5e:2x2
jax: 0.10.0
libtpu: 0.0.40
codegen_flags: <defaults>
</compile_context>

<pallas_src>
import jax
import jax.numpy as jnp
import numpy as np
from jax.experimental import pallas as pl
from jax.experimental.pallas import tpu as pltpu

# ----- configuration (mirrors src_config / tgt_config of the torch module) -----
SRC_LAYERS = 3
TGT_LAYERS = 2
SRC_HEADS = 4
TGT_HEADS = 2
SRC_HIDDEN = 32                       # src_config.hidden_size
SRC_DIM = SRC_HIDDEN // SRC_HEADS     # 8
TGT_DIM = 64
COMP = 2                              # compression_factor

B = 2
SEQ = 8                               # must be divisible by COMP


def _round_up(x, m):
    return ((x + m - 1) // m) * m


def _tile_config():
    """Generation-aware (max_tile_rows, vmem_limit_bytes)."""
    try:
        kind = jax.devices()[0].device_kind.lower()
    except Exception:
        kind = ""
    if ("v5" in kind) or ("v6" in kind):
        # 128 MiB VMEM per TensorCore: big tiles to hit the HBM roofline.
        return 16384, 96 * 1024 * 1024
    # v7x has only 64 MiB VMEM per TensorCore; also the safe default.
    return 8192, 48 * 1024 * 1024


# --------------------------- Pallas kernel ------------------------------------
def _kv_compress_kernel(k_ref, v_ref, w1_ref, b1_ref, w2_ref, b2_ref,
                        ko_ref, vo_ref):
    """Grid = (row_tiles,) [parallel].  Per tile, for K rows and V rows:
         out = relu(rows @ w1_cat + b1) @ w2_blockdiag + b2
    The source-layer softmax reduction rides the w1 contraction (probs are
    pre-folded into w1_cat); all target layers share the block-diagonal W2 so
    the store is a lane-dense (rows, T*64 = 128) bf16 slab."""
    w1 = w1_ref[...]       # (L*F, T*Dh)  bf16, resident
    b1 = b1_ref[...]       # (1, T*Dh)    f32
    w2 = w2_ref[...]       # (T*Dh, T*Do) f32, block-diagonal, resident
    b2 = b2_ref[...]       # (1, T*Do)    f32

    hk = jnp.maximum(
        jnp.dot(k_ref[...], w1, preferred_element_type=jnp.float32) + b1, 0.0)
    ko_ref[...] = (jnp.dot(hk, w2, preferred_element_type=jnp.float32)
                   + b2).astype(ko_ref.dtype)

    hv = jnp.maximum(
        jnp.dot(v_ref[...], w1, preferred_element_type=jnp.float32) + b1, 0.0)
    vo_ref[...] = (jnp.dot(hv, w2, preferred_element_type=jnp.float32)
                   + b2).astype(vo_ref.dtype)


def cross_model_kv_compress(k_rows, v_rows, w1_cat, b1_cat, w2_bd, b2_cat,
                            m_tile, vmem_limit):
    """k_rows/v_rows: (R, L*F) bf16 with R % m_tile == 0.
    Returns (k_out, v_out), each (R, T*Do) bf16."""
    R, LF = k_rows.shape
    THd = w1_cat.shape[-1]
    TDo = w2_bd.shape[-1]
    assert R % m_tile == 0 and m_tile % 8 == 0

    row_spec = pl.BlockSpec((m_tile, LF), lambda m: (m, 0))
    out_spec = pl.BlockSpec((m_tile, TDo), lambda m: (m, 0))
    in_specs = [
        row_spec,                                    # K rows (bf16)
        row_spec,                                    # V rows (bf16)
        pl.BlockSpec((LF, THd), lambda m: (0, 0)),   # prob-folded W1 (bf16)
        pl.BlockSpec((1, THd), lambda m: (0, 0)),    # concat b1
        pl.BlockSpec((THd, TDo), lambda m: (0, 0)),  # block-diag W2
        pl.BlockSpec((1, TDo), lambda m: (0, 0)),    # concat b2
    ]
    out_shape = (jax.ShapeDtypeStruct((R, TDo), jnp.bfloat16),
                 jax.ShapeDtypeStruct((R, TDo), jnp.bfloat16))

    return pl.pallas_call(
        _kv_compress_kernel,
        out_shape=out_shape,
        grid=(R // m_tile,),
        in_specs=in_specs,
        out_specs=(out_spec, out_spec),
        compiler_params=pltpu.CompilerParams(
            dimension_semantics=("parallel",),
            vmem_limit_bytes=vmem_limit),
    )(k_rows, v_rows, w1_cat, b1_cat, w2_bd, b2_cat)


# --------------------------- parameter init -----------------------------------
def _init_linear(key, fan_in, fan_out):
    # torch.nn.Linear default: U(-1/sqrt(fan_in), 1/sqrt(fan_in)) for W and b.
    k1, k2 = jax.random.split(key)
    bound = 1.0 / np.sqrt(fan_in)
    w = jax.random.uniform(k1, (fan_in, fan_out), jnp.float32, -bound, bound)
    b = jax.random.uniform(k2, (fan_out,), jnp.float32, -bound, bound)
    return w, b


class CrossModelKVCompressorJAX:
    def __init__(self, key):
        keys = jax.random.split(key, 3 + 2 * TGT_LAYERS)
        # layer_map_net: Linear(1,64) -> ReLU -> Linear(64,64) -> ReLU -> Linear(64, L)
        self.lm_w1, self.lm_b1 = _init_linear(keys[0], 1, 64)
        self.lm_w2, self.lm_b2 = _init_linear(keys[1], 64, 64)
        self.lm_w3, self.lm_b3 = _init_linear(keys[2], 64, SRC_LAYERS)
        # per-target-layer compressors: Linear(cf*D, D) -> ReLU -> Linear(D, TGT_DIM)
        w1s, b1s, w2s, b2s = [], [], [], []
        for t in range(TGT_LAYERS):
            w1, b1 = _init_linear(keys[3 + 2 * t], COMP * SRC_DIM, SRC_DIM)
            w2, b2 = _init_linear(keys[4 + 2 * t], SRC_DIM, TGT_DIM)
            w1s.append(w1); b1s.append(b1)
            w2s.append(w2); b2s.append(b2)
        self.w1 = jnp.stack(w1s)   # (T, cf*D, Dh)
        self.b1 = jnp.stack(b1s)   # (T, Dh)
        self.w2 = jnp.stack(w2s)   # (T, Dh, TGT_DIM)
        self.b2 = jnp.stack(b2s)   # (T, TGT_DIM)

    def layer_probs(self):
        # tiny MLP on a scalar per target layer -> softmax over source layers (JAX glue)
        x = (jnp.arange(TGT_LAYERS, dtype=jnp.float32) / TGT_LAYERS)[:, None]   # (T, 1)
        h = jax.nn.relu(x @ self.lm_w1 + self.lm_b1)
        h = jax.nn.relu(h @ self.lm_w2 + self.lm_b2)
        return jax.nn.softmax(h @ self.lm_w3 + self.lm_b3, axis=-1)             # (T, L)

    def packed_params(self):
        """Fold softmax probs into a concatenated W1, concat biases, block-diag W2."""
        probs = self.layer_probs()                                   # (T, L)
        T, L = probs.shape
        F, Dh = self.w1.shape[1], self.w1.shape[2]
        Do = self.w2.shape[-1]
        # w1_cat[l*F + f, t*Dh + d] = probs[t, l] * W1[t, f, d]
        w1_cat = jnp.einsum('tl,tfd->lftd', probs, self.w1).reshape(L * F, T * Dh)
        b1_cat = self.b1.reshape(1, T * Dh)
        w2_bd = jnp.zeros((T * Dh, T * Do), jnp.float32)
        for t in range(T):
            w2_bd = w2_bd.at[t * Dh:(t + 1) * Dh, t * Do:(t + 1) * Do].set(self.w2[t])
        b2_cat = self.b2.reshape(1, T * Do)
        return w1_cat.astype(jnp.bfloat16), b1_cat, w2_bd, b2_cat

    def __call__(self, src_kv_cache):
        L = len(src_kv_cache)
        b, h, s, d = src_kv_cache[0][0].shape
        assert s % COMP == 0, "seq_len must be divisible by compression_factor"
        sc = s // COMP
        assert (h * sc) % TGT_HEADS == 0
        m, f = b * h * sc, COMP * d

        # Row layout: row = (b, h, sc) compressed token, features = (layer, cf*D).
        # One stack pass per K/V (no K||V concat, no extra pad copy at these sizes);
        # the layer reduction then rides the matmul contraction inside the kernel.
        def pack(idx):
            parts = [kv[idx].astype(jnp.bfloat16).reshape(b, h, sc, f)
                     for kv in src_kv_cache]
            return jnp.stack(parts, axis=3).reshape(m, L * f)        # (m, L*f) bf16

        k_rows = pack(0)
        v_rows = pack(1)

        max_rows, vmem_limit = _tile_config()
        # >= 2 row tiles when possible so the parallel axis shards across both
        # v7x TensorCores; large tiles amortize per-grid-step overhead elsewhere.
        m_tile = min(max_rows, _round_up(max(-(-m // 2), 1), 8))
        m_pad = _round_up(m, m_tile)
        if m_pad != m:
            k_rows = jnp.pad(k_rows, ((0, m_pad - m), (0, 0)))
            v_rows = jnp.pad(v_rows, ((0, m_pad - m), (0, 0)))

        w1_cat, b1_cat, w2_bd, b2_cat = self.packed_params()
        ko, vo = cross_model_kv_compress(k_rows, v_rows, w1_cat, b1_cat,
                                         w2_bd, b2_cat, m_tile, vmem_limit)
        ko, vo = ko[:m], vo[:m]                                      # (m, T*64) bf16

        result = []
        for t in range(TGT_LAYERS):
            kt = ko[:, t * TGT_DIM:(t + 1) * TGT_DIM].reshape(b, h, sc, TGT_DIM)
            vt = vo[:, t * TGT_DIM:(t + 1) * TGT_DIM].reshape(b, h, sc, TGT_DIM)
            result.append((kt.reshape(b, TGT_HEADS, -1, TGT_DIM),
                           vt.reshape(b, TGT_HEADS, -1, TGT_DIM)))
        return result

    # pure-JAX f32 reference matching the torch forward (for correctness check)
    def reference(self, src_kv_cache):
        probs = self.layer_probs()
        out = []
        for t in range(TGT_LAYERS):
            k_comb = jnp.zeros_like(src_kv_cache[0][0])
            v_comb = jnp.zeros_like(src_kv_cache[0][1])
            for l, (k, v) in enumerate(src_kv_cache):
                k_comb = k_comb + probs[t, l] * k
                v_comb = v_comb + probs[t, l] * v
            b, h, s, d = k_comb.shape
            sc = s // COMP
            km = k_comb.reshape(b, h, sc, COMP * d)
            vm = v_comb.reshape(b, h, sc, COMP * d)

            def mlp(x):
                y = jax.nn.relu(x @ self.w1[t] + self.b1[t])
                return y @ self.w2[t] + self.b2[t]

            km = mlp(km).reshape(b, TGT_HEADS, -1, TGT_DIM)
            vm = mlp(vm).reshape(b, TGT_HEADS, -1, TGT_DIM)
            out.append((km, vm))
        return out


# ------------------------------- main ------------------------------------------
if __name__ == "__main__":
    root = jax.random.PRNGKey(0)
    k_params, k_data = jax.random.split(root)

    model = CrossModelKVCompressorJAX(k_params)

    # synthetic src KV cache: SRC_LAYERS tuples of (k, v), each (B, SRC_HEADS, SEQ, SRC_DIM)
    data_keys = jax.random.split(k_data, 2 * SRC_LAYERS)
    src_kv_cache = []
    for i in range(SRC_LAYERS):
        k = jax.random.normal(data_keys[2 * i], (B, SRC_HEADS, SEQ, SRC_DIM), jnp.float32)
        v = jax.random.normal(data_keys[2 * i + 1], (B, SRC_HEADS, SEQ, SRC_DIM), jnp.float32)
        src_kv_cache.append((k, v))

    result = model(src_kv_cache)
    jax.block_until_ready(result)

    # correctness check against the plain-JAX f32 reference (bf16 path -> looser tol)
    ref = model.reference(src_kv_cache)
    for (k_p, v_p), (k_r, v_r) in zip(result, ref):
        np.testing.assert_allclose(np.asarray(k_p).astype(np.float32),
                                   np.asarray(k_r), rtol=3e-2, atol=3e-2)
        np.testing.assert_allclose(np.asarray(v_p).astype(np.float32),
                                   np.asarray(v_r), rtol=3e-2, atol=3e-2)

    print("KERNEL_OK")
</pallas_src>

<mosaic_0001>
module attributes {stable_mosaic.version = 11 : i64} {
  func.func @_kv_compress_kernel(%arg0: i32, %arg1: memref<16x48xbf16, #tpu.memory_space<vmem>>, %arg2: memref<16x48xbf16, #tpu.memory_space<vmem>>, %arg3: memref<48x16xbf16, #tpu.memory_space<vmem>>, %arg4: memref<1x16xf32, #tpu.memory_space<vmem>>, %arg5: memref<16x128xf32, #tpu.memory_space<vmem>>, %arg6: memref<1x128xf32, #tpu.memory_space<vmem>>, %arg7: memref<16x128xbf16, #tpu.memory_space<vmem>>, %arg8: memref<16x128xbf16, #tpu.memory_space<vmem>>) attributes {dimension_semantics = [#tpu.dimension_semantics<parallel>], iteration_bounds = array<i64: 2>, scalar_prefetch = 0 : i64, scratch_operands = 0 : i64, tpu.core_type = #tpu.core_type<tc>, window_params = [{transform_indices = @transform_0, window_bounds = array<i64: 16, 48>}, {transform_indices = @transform_1, window_bounds = array<i64: 16, 48>}, {pipeline_mode = #tpu.pipeline_mode<synchronous>, transform_indices = @transform_2, window_bounds = array<i64: 48, 16>}, {pipeline_mode = #tpu.pipeline_mode<synchronous>, transform_indices = @transform_3, window_bounds = array<i64: 1, 16>}, {pipeline_mode = #tpu.pipeline_mode<synchronous>, transform_indices = @transform_4, window_bounds = array<i64: 16, 128>}, {pipeline_mode = #tpu.pipeline_mode<synchronous>, transform_indices = @transform_5, window_bounds = array<i64: 1, 128>}, {transform_indices = @transform_6, window_bounds = array<i64: 16, 128>}, {transform_indices = @transform_7, window_bounds = array<i64: 16, 128>}]} {
    %c0 = arith.constant 0 : index
    %c0_0 = arith.constant 0 : index
    %0 = vector.load %arg3[%c0, %c0_0] : memref<48x16xbf16, #tpu.memory_space<vmem>>, vector<48x16xbf16>
    %c0_1 = arith.constant 0 : index
    %c0_2 = arith.constant 0 : index
    %1 = vector.load %arg4[%c0_1, %c0_2] : memref<1x16xf32, #tpu.memory_space<vmem>>, vector<1x16xf32>
    %c0_3 = arith.constant 0 : index
    %c0_4 = arith.constant 0 : index
    %2 = vector.load %arg5[%c0_3, %c0_4] : memref<16x128xf32, #tpu.memory_space<vmem>>, vector<16x128xf32>
    %c0_5 = arith.constant 0 : index
    %c0_6 = arith.constant 0 : index
    %3 = vector.load %arg6[%c0_5, %c0_6] : memref<1x128xf32, #tpu.memory_space<vmem>>, vector<1x128xf32>
    %c0_7 = arith.constant 0 : index
    %c0_8 = arith.constant 0 : index
    %4 = vector.load %arg1[%c0_7, %c0_8] : memref<16x48xbf16, #tpu.memory_space<vmem>>, vector<16x48xbf16>
    %cst = arith.constant dense<0.000000e+00> : vector<16x16xf32>
    %5 = tpu.matmul %4, %0, %cst {dimension_numbers = #tpu.dot_dimension_numbers<[1], [0], [0], [1], [0, 0, 1, 1], [], []>} : vector<16x48xbf16>, vector<48x16xbf16>, vector<16x16xf32> -> vector<16x16xf32>
    %6 = vector.broadcast %1 : vector<1x16xf32> to vector<16x16xf32>
    %7 = arith.addf %5, %6 : vector<16x16xf32>
    %cst_9 = arith.constant 0.000000e+00 : f32
    %8 = vector.broadcast %cst_9 : f32 to vector<16x16xf32>
    %9 = arith.maximumf %7, %8 : vector<16x16xf32>
    %cst_10 = arith.constant dense<0.000000e+00> : vector<16x128xf32>
    %10 = tpu.matmul %9, %2, %cst_10 {dimension_numbers = #tpu.dot_dimension_numbers<[1], [0], [0], [1], [0, 0, 1, 1], [], []>} : vector<16x16xf32>, vector<16x128xf32>, vector<16x128xf32> -> vector<16x128xf32>
    %11 = vector.broadcast %3 : vector<1x128xf32> to vector<16x128xf32>
    %12 = arith.addf %10, %11 : vector<16x128xf32>
    %13 = arith.truncf %12 : vector<16x128xf32> to vector<16x128xbf16>
    %c0_11 = arith.constant 0 : index
    %c0_12 = arith.constant 0 : index
    %14 = vector.load %arg7[%c0_11, %c0_12] : memref<16x128xbf16, #tpu.memory_space<vmem>>, vector<16x128xbf16>
    tpu.vector_store %arg7[%c0_11, %c0_12], %13 {strides = array<i32>} : memref<16x128xbf16, #tpu.memory_space<vmem>>, vector<16x128xbf16>,
    %c0_13 = arith.constant 0 : index
    %c0_14 = arith.constant 0 : index
    %15 = vector.load %arg2[%c0_13, %c0_14] : memref<16x48xbf16, #tpu.memory_space<vmem>>, vector<16x48xbf16>
    %cst_15 = arith.constant dense<0.000000e+00> : vector<16x16xf32>
    %16 = tpu.matmul %15, %0, %cst_15 {dimension_numbers = #tpu.dot_dimension_numbers<[1], [0], [0], [1], [0, 0, 1, 1], [], []>} : vector<16x48xbf16>, vector<48x16xbf16>, vector<16x16xf32> -> vector<16x16xf32>
    %17 = vector.broadcast %1 : vector<1x16xf32> to vector<16x16xf32>
    %18 = arith.addf %16, %17 : vector<16x16xf32>
    %cst_16 = arith.constant 0.000000e+00 : f32
    %19 = vector.broadcast %cst_16 : f32 to vector<16x16xf32>
    %20 = arith.maximumf %18, %19 : vector<16x16xf32>
    %cst_17 = arith.constant dense<0.000000e+00> : vector<16x128xf32>
    %21 = tpu.matmul %20, %2, %cst_17 {dimension_numbers = #tpu.dot_dimension_numbers<[1], [0], [0], [1], [0, 0, 1, 1], [], []>} : vector<16x16xf32>, vector<16x128xf32>, vector<16x128xf32> -> vector<16x128xf32>
    %22 = vector.broadcast %3 : vector<1x128xf32> to vector<16x128xf32>
    %23 = arith.addf %21, %22 : vector<16x128xf32>
    %24 = arith.truncf %23 : vector<16x128xf32> to vector<16x128xbf16>
    %c0_18 = arith.constant 0 : index
    %c0_19 = arith.constant 0 : index
    %25 = vector.load %arg8[%c0_18, %c0_19] : memref<16x128xbf16, #tpu.memory_space<vmem>>, vector<16x128xbf16>
    tpu.vector_store %arg8[%c0_18, %c0_19], %24 {strides = array<i32>} : memref<16x128xbf16, #tpu.memory_space<vmem>>, vector<16x128xbf16>,
    return
  }
  func.func @transform_0(%arg0: i32) -> (i32, i32) {
    %c0_i32 = arith.constant 0 : i32
    %c0_i32_0 = arith.constant 0 : i32
    return %arg0, %c0_i32 : i32, i32
  }
  func.func @transform_1(%arg0: i32) -> (i32, i32) {
    %c0_i32 = arith.constant 0 : i32
    %c0_i32_0 = arith.constant 0 : i32
    return %arg0, %c0_i32 : i32, i32
  }
  func.func @transform_2(%arg0: i32) -> (i32, i32) {
    %c0_i32 = arith.constant 0 : i32
    %c0_i32_0 = arith.constant 0 : i32
    %c0_i32_1 = arith.constant 0 : i32
    return %c0_i32, %c0_i32_0 : i32, i32
  }
  func.func @transform_3(%arg0: i32) -> (i32, i32) {
    %c0_i32 = arith.constant 0 : i32
    %c0_i32_0 = arith.constant 0 : i32
    %c0_i32_1 = arith.constant 0 : i32
    return %c0_i32, %c0_i32_0 : i32, i32
  }
  func.func @transform_4(%arg0: i32) -> (i32, i32) {
    %c0_i32 = arith.constant 0 : i32
    %c0_i32_0 = arith.constant 0 : i32
    %c0_i32_1 = arith.constant 0 : i32
    return %c0_i32, %c0_i32_0 : i32, i32
  }
  func.func @transform_5(%arg0: i32) -> (i32, i32) {
    %c0_i32 = arith.constant 0 : i32
    %c0_i32_0 = arith.constant 0 : i32
    %c0_i32_1 = arith.constant 0 : i32
    return %c0_i32, %c0_i32_0 : i32, i32
  }
  func.func @transform_6(%arg0: i32) -> (i32, i32) {
    %c0_i32 = arith.constant 0 : i32
    %c0_i32_0 = arith.constant 0 : i32
    return %arg0, %c0_i32 : i32, i32
  }
  func.func @transform_7(%arg0: i32) -> (i32, i32) {
    %c0_i32 = arith.constant 0 : i32
    %c0_i32_0 = arith.constant 0 : i32
    return %arg0, %c0_i32 : i32, i32
  }
}

</mosaic_0001>

<bundles_post_ra>
// kernel: tpu_custom_call.1
= control target key start
LH: loop header
LB: loop body
LE: loop exit
PB: predicated region body
PF: predicated region fallthrough
CT: control target
= control target key end

     0   :  { %s1086_s0 = inlined_call_operand.vmem [shape: bf16[32,48], index: 0, kind: input, shape index: {}]   ;;  %s1087_s1 = inlined_call_operand.vmem [shape: bf16[32,48], index: 1, kind: input, shape index: {}]   ;;  %s1088_s2 = inlined_call_operand.vmem [shape: bf16[48,16], index: 2, kind: input, shape index: {}]   ;;  %s1089_s3 = inlined_call_operand.vmem [shape: f32[1,16], index: 3, kind: input, shape index: {}]   ;;  %s1090_s4 = inlined_call_operand.hbm [shape: f32[16,128], index: 4, kind: input, shape index: {}]   ;;  %s1091_s5 = inlined_call_operand.vmem [shape: f32[1,128], index: 5, kind: input, shape index: {}]   ;;  %s1092_s6 = inlined_call_operand.hbm [shape: bf16[32,128], index: 6, kind: output, shape index: {0}]   ;;  %s1093_s7 = inlined_call_operand.hbm [shape: bf16[32,128], index: 7, kind: output, shape index: {1}]  }
   0x1   :  { %1095 = sst [smem:[#allocation11_spill]] %s1086_s0 }
   0x2   :  { %1096 = sst [smem:[#allocation12_spill]] %s1087_s1 }
   0x3   :  { %13 = vsyncpa [#allocation3], 0 }
   0x4   :  { %14 = vsyncpa [#allocation4], 0 }
   0x5   :  { %16 = vsyncpa [#allocation4 + $0x1], 0 }
   0x6   :  { %17 = vsyncpa [#allocation7], 0 }
   0x7   :  { %19 = vsyncpa [#allocation7 + $0x1], 0  ;;  %s942_s24 = smov 0   ;;  %s944_s25 = smov 0  }
   0x8   :  { %s946_s26 = smov 0   ;;  %s948_s27 = smov 0  }
   0x9 LB: > { %s963_s28 = sadd.s32 4294967295, %s895_s27   ;;  %s643_s29 = sadd.s32 4294967294, %s895_s27   ;;  %s895_s27 = sphi %s948_s27, %s1105_s27   ;;  %s891_s26 = sphi %s946_s26, %s1104_s26   ;;  %s887_s25 = sphi %s944_s25, %s1103_s25   ;;  %s883_s24 = sphi %s942_s24, %s1102_s24  }
   0xa   : > { %s967_s30 = sadd.s32 1, %s895_s27   ;;  %s168_s8 = sadd.s32 1, %s891_s26 }
   0xb   : > { %s165_s9 = ssub.s32 %s895_s27, %s967_s30  ;;  %p178_p0 = scmp.ne.s32.totalorder %s891_s26, %s887_s25 }
   0xc   : > { %p166_p1 = scmp.eq.s32.totalorder %s165_s9, 0  ;;  %p179_p2 = scmp.eq.s32.totalorder %s963_s28, 1 }
   0xd   : > { %p184_p3 = scmp.ne.s32.totalorder %s887_s25, %s883_s24  ;;  %p185_p4 = scmp.eq.s32.totalorder %s643_s29, 1 }
   0xe   : > { %s978_s10 = scalar_select %p166_p1, %s891_s26, %s168_s8  }
   0xf   : > { %p980_p5 = por %p179_p2, %p178_p0  ;;  %p984_p6 = por %p185_p4, %p184_p3 }
  0x10   : > { %p644_p7 = scmp.ge.s32.totalorder %s895_s27, 1  ;;  %p218_p8 = scmp.lt.s32.totalorder %s895_s27, 3 }
  0x11   : > { %p725_p9 = scmp.eq.s32.totalorder %s963_s28, 0  ;;  %s235_s15 = sshll.u32 %s1090_s4, 4  ;;  %s236_s15 = int_to_ptr.hbm [resolvable:$true] %s235_s15 }
  0x12   : > { %p219_p10 = pnand %p644_p7, %p218_p8  ;;  %s897_s16 = smov [#allocation2]  }
  0x13   : > { %s237_s17 = sshll.u32 %s897_s16, 4  ;;  %s898_s18 = smov 128   ;;  %s238_s17 = int_to_ptr.vmem [resolvable:$true] %s237_s17 }
  0x14   : > { %p714_p11 = pneg %p219_p10  ;;  %s899_s19 = smov 8  }
  0x15   : > { %274 = sbr.rel (%p219_p10) target bundleno = 326 (0x146), region = 44 }
  0x16   : > { %p715_p12 = pnand %p725_p9, %p714_p11 }
  0x18   : > { %717 = dma.hbm_to_vmem [thread:$0]  (!%p715_p12), %s236_s15, 256, %s238_s17, [#allocation3], %s898_s18, %s898_s18, %s899_s19  }
  0x1a   : > { %870 = dma.done.wait (%p725_p9), [#allocation3], 256  }
  0x1b   : > { %872 = vsyncadd (%p725_p9), [#allocation3], 4294967040  ;;  %s651_s20 = sshll.u32 %s963_s28, 1  ;;  %v691_v0 = vld [vmem:[%s1088_s2 + $0x10] sm:$0xff]  ;;  %v690_v1 = vld [vmem:[%s1088_s2 + $0x8] sm:$0xff]  ;;  %s1099_s1 = sld [smem:[#allocation12_spill]] }
  0x1c   : > { %p318_p13 = scmp.lt.s32.totalorder %s651_s20, 3  ;;  %442 = vmatpush.bf16.msra.mxu2 %v691_v0  ;;  %379 = vmatpush.bf16.msra.mxu0 %v691_v0  ;;  %v689_v2 = vld [vmem:[%s1088_s2] sm:$0xff]  ;;  %s1100_s0 = sld [smem:[#allocation11_spill]]  ;;  %vm370_vm0 = vcmask 392192   ;;  %v340_v5 = vld [vmem:[#allocation2 + $0x8] sm:$0xff]  ;;  %vm393_vm1 = vcmask 130048  }
  0x1d   : > { %414 = vmatpush.msra.mxu1 %v340_v5  ;;  %473 = vmatpush.msra.mxu3 %v340_v5  ;;  %v339_v6 = vld [vmem:[#allocation2] sm:$0xff]  ;;  %s1020_s22 = sand.u32 1, %s887_s25   ;;  %s694_s23 = sshll.u32 %s963_s28, 3 }
  0x1e   : > { %s1107_s20 = smov (!%p318_p13, %s651_s20), 3  ;;  %v765_v7 = vld [vmem:[%s1089_s3] ss:$0 sm:$0xff]  ;;  %s1094_s29 = sshll.u32 %s1020_s22, 3 }
  0x1f   : > { %s652_s8 = sshll.u32 %s1107_s20, 2  ;;  %415 = vmatpush.msra.mxu1 %v339_v6  ;;  %474 = vmatpush.msra.mxu3 %v339_v6  ;;  %v766_v21 = vld [vmem:[%s1091_s5] ss:$0 sm:$0xff]  ;;  %s503_s15 = scalar_lea.hbm %s1092_s6, %s694_s23 }
  0x20   : > { %443 = vmatpush.bf16.msra.mxu2 %v690_v1  ;;  %380 = vmatpush.bf16.msra.mxu0 %v690_v1  ;;  %s506_s18 = sshll.u32 %s503_s15, 4  ;;  %s817_s13 = scalar_lea.hbm %s1092_s6, 16  ;;  %s507_s18 = int_to_ptr.hbm [resolvable:$true] %s506_s18 }
  0x21   : > { %s327_s16 = scalar_lea.vmem %s1099_s1, %s652_s8  ;;  %s811_s20 = sshra.s32 %s507_s18, 4  ;;  %s812_s20 = int_to_ptr.hbm [resolvable:$true] %s811_s20 }
  0x22   : > { %s321_s19 = scalar_lea.vmem %s1100_s0, %s652_s8  ;;  %v693_v3 = vld [vmem:[%s327_s16] sm:$0xff]  ;;  %s309_s16 = scalar_lea.vmem [#allocation5], %s1094_s29 }
  0x23   : > { %v692_v4 = vld [vmem:[%s321_s19] sm:$0xff]  ;;  %s504_s17 = sshll.u32 %s309_s16, 4  ;;  %s487_s19 = scalar_lea.sflag [#allocation4], %s1020_s22  ;;  %s505_s17 = int_to_ptr.vmem [resolvable:$true] %s504_s17 }
  0x24   : > { %444 = vmatpush.bf16.msra.mxu2 %v689_v2  ;;  %381 = vmatpush.bf16.msra.mxu0 %v689_v2  ;;  %s813_s21 = scalar_lea.hbm %s812_s20, 8  ;;  %p818_p3 = scmp.lt.s32.totalorder %s812_s20, %s1092_s6 }
  0x25   : > { %p814_p0 = scmp.ne.s32.totalorder %s812_s20, %s813_s21  ;;  %p819_p4 = scmp.lt.s32.totalorder %s817_s13, %s813_s21 }
  0x27   : > { %678 = vmatmul.msk.bf16.vlgmr.msra.gmra.mxu2 %vm370_vm0, %v693_v3  ;;  %671 = vmatmul.msk.bf16.vlgmr.msra.gmra.mxu0 %vm370_vm0, %v692_v4  ;;  %p815_p1 = pnand %p814_p0, %p980_p5  ;;  %p820_p7 = por %p819_p4, %p818_p3 }
  0x29   : > { %p816_p2 = pneg %p815_p1 }
  0x2b   : > { %p821_p8 = pnand %p820_p7, %p816_p2 }
  0xa4   : > { %v383_v8 = vpop.f32.mrf.mxu0 }
  0xa5   : > { %v384_v9 = vadd.f32 %v765_v7, %v383_v8 }
  0xa7   : > { %v388_v10 = vmax.f32 %v384_v9, 0.0 }
  0xa9   : > { %672 = vmatmul.msk.f32.vlgmr.msra.gmra.mxu1 %vm393_vm1, %v388_v10 }
  0xaa   : > { %v446_v11 = vpop.f32.mrf.mxu2 }
  0xab   : > { %v447_v12 = vadd.f32 %v765_v7, %v446_v11 }
  0xac   : > { %v385_v13 = vpop.f32.mrf.mxu0 }
  0xad   : > { %v451_v14 = vmax.f32 %v447_v12, 0.0  ;;  %v386_v15 = vadd.f32 %v765_v7, %v385_v13 }
  0xaf   : > { %679 = vmatmul.msk.f32.vlgmr.msra.gmra.mxu3 %vm393_vm1, %v451_v14  ;;  %v389_v16 = vmax.f32 %v386_v15, 0.0 }
  0xb1   : > { %673 = vmatmul.msk.f32.gmra.mxu1 %vm393_vm1, %v389_v16 }
  0xb2   : > { %v448_v17 = vpop.f32.mrf.mxu2 }
  0xb3   : > { %v449_v18 = vadd.f32 %v765_v7, %v448_v17 }
  0xb5   : > { %v452_v19 = vmax.f32 %v449_v18, 0.0 }
  0xb7   : > { %680 = vmatmul.msk.f32.gmra.mxu3 %vm393_vm1, %v452_v19 }
 0x126   : > { %v417_v20 = vpop.f32.mrf.mxu1 }
 0x127   : > { %v418_v22 = vadd.f32 %v766_v21, %v417_v20 }
 0x12e   : > { %v420_v23 = vpop.f32.mrf.mxu1 }
 0x12f   : > { %v421_v24 = vadd.f32 %v766_v21, %v420_v23 }
 0x131   : > { %v699_v25 = vpack.c.bf16 %v421_v24, %v418_v22 }
 0x132   : > { %v476_v26 = vpop.f32.mrf.mxu3 }
 0x133   : > { %700 = vst [vmem:[%s309_s16] sm:$0xff] %v699_v25  }
 0x134   : > { %824 = shalt.err (!%p821_p8)
}
 0x135   : > { %s900_s16 = smov 64   ;;  %s901_s29 = smov 4   ;;  %v477_v28 = vadd.f32 %v766_v21, %v476_v26 }
 0x136   : > { %710 = dma.vmem_to_hbm [thread:$0]  (%p980_p5), %s505_s17, 128, %s507_s18, %s487_s19, %s900_s16, %s900_s16, %s901_s29  }
 0x137   : > { %s520_s20 = scalar_lea.hbm %s1093_s7, %s694_s23  ;;  %s1101_s21 = sshll.u32 %s1020_s22, 3 }
 0x138   : > { %s316_s13 = scalar_lea.vmem [#allocation6], %s1101_s21  ;;  %s523_s15 = sshll.u32 %s520_s20, 4  ;;  %s524_s15 = int_to_ptr.hbm [resolvable:$true] %s523_s15 }
 0x139   : > { %s521_s14 = sshll.u32 %s316_s13, 4  ;;  %s492_s0 = scalar_lea.sflag [#allocation7], %s1020_s22  ;;  %s522_s14 = int_to_ptr.vmem [resolvable:$true] %s521_s14 }
 0x13a   : > { %v479_v27 = vpop.f32.mrf.mxu3  ;;  %s839_s1 = sshra.s32 %s524_s15, 4  ;;  %s845_s18 = scalar_lea.hbm %s1093_s7, 16  ;;  %s840_s1 = int_to_ptr.hbm [resolvable:$true] %s839_s1 }
 0x13b   : > { %v480_v29 = vadd.f32 %v766_v21, %v479_v27  ;;  %s841_s28 = scalar_lea.hbm %s840_s1, 8  ;;  %p846_p12 = scmp.lt.s32.totalorder %s840_s1, %s1093_s7 }
 0x13c   : > { %p842_p9 = scmp.ne.s32.totalorder %s840_s1, %s841_s28  ;;  %p847_p13 = scmp.lt.s32.totalorder %s845_s18, %s841_s28 }
 0x13d   : > { %v704_v30 = vpack.c.bf16 %v480_v29, %v477_v28 }
 0x13e   : > { %p843_p10 = pnand %p842_p9, %p980_p5  ;;  %p848_p0 = por %p847_p13, %p846_p12 }
 0x13f   : > { %705 = vst [vmem:[%s316_s13] sm:$0xff] %v704_v30  }
 0x140   : > { %p844_p11 = pneg %p843_p10 }
 0x142   : > { %p849_p1 = pnand %p848_p0, %p844_p11 }
 0x144   : > { %852 = shalt.err (!%p849_p1)
}
 0x145   : > { %711 = dma.vmem_to_hbm [thread:$0]  (%p980_p5), %s522_s14, 128, %s524_s15, %s492_s0, %s900_s16, %s900_s16, %s901_s29  }
 0x146 PF: > { %p727_p2 = scmp.ge.s32.totalorder %s895_s27, 2  ;;  %s538_s22 = sand.u32 1, %s883_s24  }
 0x147   : > { %s539_s1 = scalar_lea.sflag [#allocation4], %s538_s22 }
 0x148   : > { %p719_p3 = pnand %p727_p2, %p984_p6 }
 0x14a   : > { %p720_p4 = pneg %p719_p3 }
 0x14c   : > { %874 = dma.done.wait (%p720_p4), %s539_s1, 128  }
 0x14d   : > { %876 = vsyncadd (%p720_p4), %s539_s1, 4294967168  ;;  %s549_s9 = scalar_lea.sflag [#allocation7], %s538_s22 }
 0x14e   : > { %878 = dma.done.wait (%p720_p4), %s549_s9, 128  }
 0x14f   : > { %880 = vsyncadd (%p720_p4), %s549_s9, 4294967168  ;;  %p22_p5 = scmp.ge.s32.totalorder %s967_s30, 4   ;;  %s1102_s24 = smov %s887_s25 }
 0x150   : > { %s1103_s25 = smov %s891_s26  ;;  %s1104_s26 = smov %s978_s10 }
 0x151   : > { %s1105_s27 = smov %s967_s30  ;;  %24 = sbr.rel (!%p22_p5) target bundleno = 9 (0x9), region = 104 }
 0x156   :  { %555 = vsyncpa [#allocation3], 1 }
 0x157   :  { %557 = vsyncpa [#allocation3 + $0x1], 1 }
 0x158   :  { %558 = vsyncpa [#allocation4], 1 }
 0x159   :  { %560 = vsyncpa [#allocation4 + $0x1], 1 }
 0x15a   :  { %561 = vsyncpa [#allocation7], 1 }
 0x15b   :  { %563 = vsyncpa [#allocation7 + $0x1], 1 }

</bundles_post_ra>
